<compile_context>
chip_gen: v5e
topology: v5e:2x2
jax: 0.10.0
libtpu: 0.0.40
codegen_flags: <defaults>
</compile_context>

<pallas_src>
import functools
import math

import jax
import jax.numpy as jnp
from jax.experimental import pallas as pl
from jax.experimental.pallas import tpu as pltpu


# TODO(synk): `prepare_tensors` is not defined in the reference source; it is
# treated as a pass-through tensor-conversion step (inputs used as-is).


def _round_up(x, m):
    return -(-x // m) * m


def _choose_batch_tile(B):
    """Big batch tiles (amortize per-grid-step overhead), but keep >= 2 grid
    steps when the batch allows so v7x's two TensorCores both get work."""
    if B <= 16:
        return _round_up(max(B, 1), 8)
    n_tiles = max(2, -(-B // 2048))          # tiles capped near 2048 rows
    return _round_up(-(-B // n_tiles), 8)    # sublane-aligned tile


def _shaping_kernel(x_ref, p_ref, out_ref, *, d_pad, h_pad):
    """One batch tile of the 3-layer MLP. All parameters live in p_ref."""
    slope = jnp.float32(0.01)

    o_w2 = d_pad
    o_b = d_pad + h_pad

    # Static slices of the packed parameter slab (offsets are 8-aligned).
    w1 = p_ref[0:d_pad, :]                               # (d_pad, h_pad) bf16
    w2 = p_ref[o_w2:o_w2 + h_pad, :].astype(jnp.float32)  # (h_pad, h_pad)
    aux = p_ref[o_b:o_b + 8, :].astype(jnp.float32)        # rows: b1,b2,w3,b3
    b1 = aux[0:1, :]
    b2 = aux[1:2, :]
    w3 = aux[2:3, :]
    b3 = aux[3:4, 0:1]

    x = x_ref[...]                                        # (TB, d_pad) bf16

    # Layer 1: torch.cat already folded into the single [state|mf] input.
    h1 = jnp.dot(x, w1, preferred_element_type=jnp.float32) + b1
    h1 = jnp.where(h1 > 0, h1, slope * h1)                # LeakyReLU

    # Layer 2 on the f32 accumulator.
    h2 = jnp.dot(h1, w2, preferred_element_type=jnp.float32) + b2
    h2 = jnp.where(h2 > 0, h2, slope * h2)                # LeakyReLU

    # Layer 3: scalar head as a lane reduction -> (TB, 1). Only 4 B/row of
    # real value ever reaches HBM (no 128-lane padding writeback).
    v = jnp.sum(h2 * w3, axis=1, keepdims=True) + b3
    out_ref[...] = v.astype(out_ref.dtype)


def pack_params(params, state_shape, mf_shape, dtype=jnp.bfloat16):
    """Pack W1/W2/(b1,b2,w3,b3) into one lane-dense (R, 128k) slab (one DMA)."""
    w1, b1, w2, b2, w3, b3 = (params[k] for k in
                              ("w1", "b1", "w2", "b2", "w3", "b3"))
    S, M = state_shape, mf_shape
    H = w2.shape[0]
    d_in = S + M
    d_pad = _round_up(d_in, 8)
    h_pad = _round_up(H, 128)
    L = h_pad  # slab / hidden-activation lane width

    w1p = jnp.zeros((d_pad, L), jnp.float32).at[:d_in, :H].set(w1)
    w2p = jnp.zeros((h_pad, L), jnp.float32).at[:H, :H].set(w2)

    aux = jnp.zeros((8, L), jnp.float32)
    aux = aux.at[0, :H].set(b1.reshape(-1))
    aux = aux.at[1, :H].set(b2.reshape(-1))
    aux = aux.at[2, :H].set(w3.reshape(-1))       # output weights as a row
    aux = aux.at[3, 0].set(b3.reshape(-1)[0])     # output bias (scalar)

    slab = jnp.concatenate([w1p, w2p, aux], axis=0).astype(dtype)
    meta = dict(S=S, M=M, H=H, d_pad=d_pad, h_pad=h_pad)
    return slab, meta


def shaping_model_forward(state_input, mf_input, slab, meta):
    """state: (S,) or (B,S), mf: (M,) or (B,M)  ->  value: (1,) or (B,1)."""
    d_pad, h_pad = meta["d_pad"], meta["h_pad"]

    single = (state_input.ndim == 1)
    if single:
        state_input = state_input[None, :]
        mf_input = mf_input[None, :]
    B = state_input.shape[0]

    # Fold torch.cat once on the wrapper side; cast to bf16 for the HBM read.
    x = jnp.concatenate([state_input, mf_input], axis=-1).astype(slab.dtype)

    TB = _choose_batch_tile(B)
    B_pad = _round_up(B, TB)
    if x.shape != (B_pad, d_pad):
        x = jnp.pad(x, ((0, B_pad - x.shape[0]), (0, d_pad - x.shape[1])))

    R, L = slab.shape
    grid = (B_pad // TB,)
    kernel = functools.partial(_shaping_kernel, d_pad=d_pad, h_pad=h_pad)

    flops = 2 * B_pad * (d_pad * h_pad + h_pad * h_pad + h_pad)
    bytes_accessed = (B_pad * d_pad * 2) + int(slab.size) * 2 + B_pad * 4

    out = pl.pallas_call(
        kernel,
        out_shape=jax.ShapeDtypeStruct((B_pad, 1), jnp.float32),
        grid_spec=pl.GridSpec(
            grid=grid,
            in_specs=[
                pl.BlockSpec((TB, d_pad), lambda i: (i, 0)),   # [state|mf] tile
                # constant block index -> weights DMA'd once, VMEM-resident
                pl.BlockSpec((R, L), lambda i: (0, 0)),
            ],
            out_specs=pl.BlockSpec((TB, 1), lambda i: (i, 0)),
        ),
        compiler_params=pltpu.CompilerParams(
            dimension_semantics=("parallel",)),
        cost_estimate=pl.CostEstimate(
            flops=int(flops), transcendentals=0,
            bytes_accessed=int(bytes_accessed)),
    )(x, slab)

    value = out if B == B_pad else out[:B]
    if single:
        value = value[0]           # (1,), matching torch Linear on a 1-D input
    return value


def _xavier_uniform(key, fan_in, fan_out, gain):
    bound = gain * math.sqrt(6.0 / (fan_in + fan_out))
    # stored as (in, out) so the kernel computes x @ W
    return jax.random.uniform(key, (fan_in, fan_out), jnp.float32,
                              minval=-bound, maxval=bound)


def _bias_default(key, fan_in, fan_out):
    # PyTorch nn.Linear default bias init: U(-1/sqrt(fan_in), 1/sqrt(fan_in))
    bound = 1.0 / math.sqrt(fan_in)
    return jax.random.uniform(key, (1, fan_out), jnp.float32,
                              minval=-bound, maxval=bound)


def init_params(key, state_shape, mf_shape, num_of_units):
    d_in = state_shape + mf_shape
    h = num_of_units
    # gain = calculate_gain('leaky_relu') with default negative_slope=0.01
    gain = math.sqrt(2.0 / (1.0 + 0.01 ** 2))
    keys = jax.random.split(key, 6)
    return {
        "w1": _xavier_uniform(keys[0], d_in, h, gain),
        "b1": _bias_default(keys[1], d_in, h),
        "w2": _xavier_uniform(keys[2], h, h, gain),
        "b2": _bias_default(keys[3], h, h),
        "w3": _xavier_uniform(keys[4], h, 1, gain),
        "b3": _bias_default(keys[5], h, 1),
    }


if __name__ == "__main__":
    STATE_SHAPE = 16
    MF_SHAPE = 16
    NUM_UNITS = 32
    BATCH = 256   # -> 2 batch tiles of 128: exercises the parallel grid axis

    key = jax.random.PRNGKey(0)
    k_params, k_state, k_mf = jax.random.split(key, 3)

    params = init_params(k_params, STATE_SHAPE, MF_SHAPE, NUM_UNITS)
    slab, meta = pack_params(params, STATE_SHAPE, MF_SHAPE)

    state_b = jax.random.normal(k_state, (BATCH, STATE_SHAPE), jnp.float32)
    mf_b = jax.random.normal(k_mf, (BATCH, MF_SHAPE), jnp.float32)

    # Batched path (the performance path).
    value_b = jax.block_until_ready(shaping_model_forward(state_b, mf_b, slab, meta))

    # Original single-sample semantics: 1-D state/mf -> (1,) value.
    value_1 = jax.block_until_ready(
        shaping_model_forward(state_b[0], mf_b[0], slab, meta))

    # Pure-JAX reference (same math, bf16-rounded params/inputs, f32 compute).
    f32 = jnp.float32
    q = lambda a: a.astype(jnp.bfloat16).astype(f32)
    hp = jax.lax.Precision.HIGHEST
    x = q(jnp.concatenate([state_b, mf_b], axis=-1))
    h1 = jnp.dot(x, q(params["w1"]), precision=hp) + q(params["b1"])
    h1 = jnp.where(h1 > 0, h1, 0.01 * h1)
    h2 = jnp.dot(h1, q(params["w2"]), precision=hp) + q(params["b2"])
    h2 = jnp.where(h2 > 0, h2, 0.01 * h2)
    ref_b = jnp.dot(h2, q(params["w3"]), precision=hp) + q(params["b3"])

    assert value_b.shape == (BATCH, 1)
    assert value_1.shape == (1,)
    assert jnp.allclose(value_b, ref_b, atol=2e-3, rtol=2e-3), (
        float(jnp.max(jnp.abs(value_b - ref_b))))
    assert jnp.allclose(value_1, ref_b[0], atol=2e-3, rtol=2e-3)

    print("KERNEL_OK")
</pallas_src>

<mosaic_0001>
module attributes {stable_mosaic.version = 11 : i64} {
  func.func @_shaping_kernel(%arg0: i32, %arg1: memref<128x32xbf16, #tpu.memory_space<vmem>>, %arg2: memref<168x128xbf16, #tpu.memory_space<vmem>>, %arg3: memref<128x1xf32, #tpu.memory_space<vmem>>) attributes {dimension_semantics = [#tpu.dimension_semantics<parallel>], iteration_bounds = array<i64: 2>, scalar_prefetch = 0 : i64, scratch_operands = 0 : i64, tpu.core_type = #tpu.core_type<tc>, window_params = [{transform_indices = @transform_0, window_bounds = array<i64: 128, 32>}, {pipeline_mode = #tpu.pipeline_mode<synchronous>, transform_indices = @transform_1, window_bounds = array<i64: 168, 128>}, {transform_indices = @transform_2, window_bounds = array<i64: 128, 1>}]} {
    %c0 = arith.constant 0 : index
    %c0_0 = arith.constant 0 : index
    %0 = vector.load %arg2[%c0, %c0_0] : memref<168x128xbf16, #tpu.memory_space<vmem>>, vector<32x128xbf16>
    %c32 = arith.constant 32 : index
    %c0_1 = arith.constant 0 : index
    %1 = vector.load %arg2[%c32, %c0_1] : memref<168x128xbf16, #tpu.memory_space<vmem>>, vector<128x128xbf16>
    %2 = arith.extf %1 : vector<128x128xbf16> to vector<128x128xf32>
    %c160 = arith.constant 160 : index
    %c0_2 = arith.constant 0 : index
    %3 = vector.load %arg2[%c160, %c0_2] : memref<168x128xbf16, #tpu.memory_space<vmem>>, vector<8x128xbf16>
    %4 = arith.extf %3 : vector<8x128xbf16> to vector<8x128xf32>
    %5 = vector.extract_strided_slice %4 {offsets = [0, 0], sizes = [1, 128], strides = [1, 1]} : vector<8x128xf32> to vector<1x128xf32>
    %6 = vector.extract_strided_slice %4 {offsets = [1, 0], sizes = [1, 128], strides = [1, 1]} : vector<8x128xf32> to vector<1x128xf32>
    %7 = vector.extract_strided_slice %4 {offsets = [2, 0], sizes = [1, 128], strides = [1, 1]} : vector<8x128xf32> to vector<1x128xf32>
    %8 = vector.extract_strided_slice %4 {offsets = [3, 0], sizes = [1, 1], strides = [1, 1]} : vector<8x128xf32> to vector<1x1xf32>
    %c0_3 = arith.constant 0 : index
    %c0_4 = arith.constant 0 : index
    %9 = vector.load %arg1[%c0_3, %c0_4] : memref<128x32xbf16, #tpu.memory_space<vmem>>, vector<128x32xbf16>
    %cst = arith.constant dense<0.000000e+00> : vector<128x128xf32>
    %10 = tpu.matmul %9, %0, %cst {dimension_numbers = #tpu.dot_dimension_numbers<[1], [0], [0], [1], [0, 0, 1, 1], [], []>} : vector<128x32xbf16>, vector<32x128xbf16>, vector<128x128xf32> -> vector<128x128xf32>
    %11 = vector.broadcast %5 : vector<1x128xf32> to vector<128x128xf32>
    %12 = arith.addf %10, %11 : vector<128x128xf32>
    %cst_5 = arith.constant 0.000000e+00 : f32
    %13 = vector.broadcast %cst_5 : f32 to vector<128x128xf32>
    %14 = arith.cmpf ogt, %12, %13 : vector<128x128xf32>
    %cst_6 = arith.constant 0.00999999977 : f32
    %15 = vector.broadcast %cst_6 : f32 to vector<128x128xf32>
    %16 = arith.mulf %15, %12 : vector<128x128xf32>
    %17 = arith.select %14, %12, %16 : vector<128x128xi1>, vector<128x128xf32>
    %cst_7 = arith.constant dense<0.000000e+00> : vector<128x128xf32>
    %18 = tpu.matmul %17, %2, %cst_7 {dimension_numbers = #tpu.dot_dimension_numbers<[1], [0], [0], [1], [0, 0, 1, 1], [], []>} : vector<128x128xf32>, vector<128x128xf32>, vector<128x128xf32> -> vector<128x128xf32>
    %19 = vector.broadcast %6 : vector<1x128xf32> to vector<128x128xf32>
    %20 = arith.addf %18, %19 : vector<128x128xf32>
    %cst_8 = arith.constant 0.000000e+00 : f32
    %21 = vector.broadcast %cst_8 : f32 to vector<128x128xf32>
    %22 = arith.cmpf ogt, %20, %21 : vector<128x128xf32>
    %cst_9 = arith.constant 0.00999999977 : f32
    %23 = vector.broadcast %cst_9 : f32 to vector<128x128xf32>
    %24 = arith.mulf %23, %20 : vector<128x128xf32>
    %25 = arith.select %22, %20, %24 : vector<128x128xi1>, vector<128x128xf32>
    %26 = vector.broadcast %7 : vector<1x128xf32> to vector<128x128xf32>
    %27 = arith.mulf %25, %26 : vector<128x128xf32>
    %cst_10 = arith.constant dense<0.000000e+00> : vector<128xf32>
    %28 = vector.multi_reduction <add>, %27, %cst_10 [1] : vector<128x128xf32> to vector<128xf32>
    %29 = vector.shape_cast %28 : vector<128xf32> to vector<128x1xf32>
    %30 = vector.broadcast %8 : vector<1x1xf32> to vector<128x1xf32>
    %31 = arith.addf %29, %30 : vector<128x1xf32>
    %c0_11 = arith.constant 0 : index
    %c0_12 = arith.constant 0 : index
    %32 = vector.load %arg3[%c0_11, %c0_12] : memref<128x1xf32, #tpu.memory_space<vmem>>, vector<128x1xf32>
    tpu.vector_store %arg3[%c0_11, %c0_12], %31 {strides = array<i32>} : memref<128x1xf32, #tpu.memory_space<vmem>>, vector<128x1xf32>,
    return
  }
  func.func @transform_0(%arg0: i32) -> (i32, i32) {
    %c0_i32 = arith.constant 0 : i32
    %c0_i32_0 = arith.constant 0 : i32
    return %arg0, %c0_i32 : i32, i32
  }
  func.func @transform_1(%arg0: i32) -> (i32, i32) {
    %c0_i32 = arith.constant 0 : i32
    %c0_i32_0 = arith.constant 0 : i32
    %c0_i32_1 = arith.constant 0 : i32
    return %c0_i32, %c0_i32_0 : i32, i32
  }
  func.func @transform_2(%arg0: i32) -> (i32, i32) {
    %c0_i32 = arith.constant 0 : i32
    %c0_i32_0 = arith.constant 0 : i32
    return %arg0, %c0_i32 : i32, i32
  }
}

</mosaic_0001>

<bundles_post_ra>
// kernel: tpu_custom_call.1
= control target key start
LH: loop header
LB: loop body
LE: loop exit
PB: predicated region body
PF: predicated region fallthrough
CT: control target
= control target key end

     0   :  { %s804_s9 = smov 0   ;;  %s970_s0 = inlined_call_operand.vmem [shape: bf16[256,32], index: 0, kind: input, shape index: {}]   ;;  %s971_s1 = inlined_call_operand.vmem [shape: bf16[168,128], index: 1, kind: input, shape index: {}]   ;;  %s972_s2 = inlined_call_operand.vmem [shape: f32[256,1], index: 2, kind: output, shape index: {}]  }
   0x1 LB: > { %s630_s10 = sadd.s32 4294967295, %s787_s9   ;;  %p634_p0 = scmp.ge.s32.totalorder %s787_s9, 1  ;;  %s787_s9 = sphi %s804_s9, %s12_s9  }
   0x2   : > { %p113_p1 = scmp.lt.s32.totalorder %s787_s9, 3 }
   0x4   : > { %p114_p2 = pnand %p634_p0, %p113_p1 }
   0x5   : > { %s635_s13 = sshll.u32 (!%p114_p2), %s630_s10, 4 }
   0x6   : > { %117 = sbr.rel (%p114_p2) target bundleno = 513 (0x201), region = 28  ;;  %p136_p3 = scmp.lt.s32.totalorder (!%p114_p2), %s635_s13, 31 }
   0xb   : > { %v690_v0 = vld [vmem:[%s971_s1 + $0x8] sm:$0xff]  ;;  %v689_v1 = vld [vmem:[%s971_s1] sm:$0xff]  ;;  %s974_s13 = smov (!%p136_p3, %s635_s13), 31  ;;  %vm255_vm0 = vcmask 261120   ;;  %v736_v13 = vld [vmem:[%s971_s1 + $0x38] sm:$0xff]  }
   0xc   : > { %286 = vmatpush.bf16.msra.mxu0 %v690_v0  ;;  %739 = vmatpush.bf16.msra.mxu3 %v690_v0  ;;  %s636_s16 = sshll.u32 %s974_s13, 2  ;;  %v738_v8 = vld [vmem:[%s971_s1 + $0x48] sm:$0xff]   ;;  %v737_v9 = vld [vmem:[%s971_s1 + $0x40] sm:$0xff]   ;;  %v722_v15 = vunpack.c.h.bf16 %v736_v13  ;;  %v735_v16 = vld [vmem:[%s971_s1 + $0x30] sm:$0xff]   ;;  %v721_v17 = vunpack.c.l.bf16 %v736_v13  ;;  %s638_s11 = sshll.u32 %s974_s13, 3 }
   0xd   : > { %s824_s19 = scalar_lea.vmem %s970_s0, %s636_s16  ;;  %v730_v10 = vunpack.c.h.bf16 %v738_v8  ;;  %v729_v11 = vunpack.c.l.bf16 %v738_v8  ;;  %v726_v12 = vunpack.c.h.bf16 %v737_v9  ;;  %v725_v14 = vunpack.c.l.bf16 %v737_v9  ;;  %v734_v20 = vld [vmem:[%s971_s1 + $0x28] sm:$0xff]   ;;  %v733_v23 = vld [vmem:[%s971_s1 + $0x20] sm:$0xff]   ;;  %v732_v26 = vld [vmem:[%s971_s1 + $0x18] sm:$0xff]   ;;  %s933_s15 = scalar_lea.vmem %s972_s2, %s638_s11 }
   0xe   : > { %v691_v2 = vld [vmem:[%s824_s19] sm:$0xff]  ;;  %v696_v3 = vld [vmem:[%s824_s19 + $0x28] sm:$0xff]  ;;  %v697_v5 = vld [vmem:[%s824_s19 + $0x30] sm:$0xff]  ;;  %v718_v18 = vunpack.c.h.bf16 %v735_v16  ;;  %v717_v21 = vunpack.c.l.bf16 %v735_v16  ;;  %v714_v22 = vunpack.c.h.bf16 %v734_v20  ;;  %v713_v24 = vunpack.c.l.bf16 %v734_v20 }
   0xf   : > { %v692_v4 = vld [vmem:[%s824_s19 + $0x8] sm:$0xff]  ;;  %v693_v6 = vld [vmem:[%s824_s19 + $0x10] sm:$0xff]  ;;  %v698_v7 = vld [vmem:[%s824_s19 + $0x38] sm:$0xff]  ;;  %378 = vmatpush.msra.mxu1 %v730_v10  ;;  %741 = vmatpush.msra.mxu2 %v730_v10  ;;  %v710_v25 = vunpack.c.h.bf16 %v733_v23  ;;  %v709_v27 = vunpack.c.l.bf16 %v733_v23  ;;  %v706_v28 = vunpack.c.h.bf16 %v732_v26  ;;  %v705_v30 = vunpack.c.l.bf16 %v732_v26 }
  0x10   : > { %287 = vmatpush.bf16.msra.mxu0 %v689_v1  ;;  %740 = vmatpush.bf16.msra.mxu3 %v689_v1  ;;  %v694_v19 = vld [vmem:[%s824_s19 + $0x18] sm:$0xff]  ;;  %v695_v29 = vld [vmem:[%s824_s19 + $0x20] sm:$0xff]  ;;  %v731_v31 = vld [vmem:[%s971_s1 + $0x10] sm:$0xff]  }
  0x11   : > { %379 = vmatpush.msra.mxu1 %v729_v11  ;;  %743 = vmatpush.msra.mxu2 %v729_v11  ;;  %v702_v32 = vunpack.c.h.bf16 %v731_v31  ;;  %v701_v33 = vunpack.c.l.bf16 %v731_v31  ;;  %v184_v34 = vld [vmem:[%s971_s1 + $0x50] sm:$0xf] }
  0x12   : > { %v869_v35 = vunpack.c.l.bf16 %v184_v34 }
  0x13   : > { %679 = vmatmul.msk.bf16.vlgmr.msra.gmra.mxu0 %vm255_vm0, %v691_v2  ;;  %684 = vmatmul.msk.bf16.vlgmr.msra.gmra.mxu3 %vm255_vm0, %v696_v3 }
  0x14   : > { %742 = vmatpush.msrb.mxu3 %v730_v10  ;;  %380 = vmatpush.msra.mxu1 %v726_v12  ;;  %v872_v36 = vperm.slane %v869_v35, 0 }
  0x15   : > { %745 = vmatpush.msra.mxu2 %v726_v12 }
  0x16   : > { %744 = vmatpush.msrb.mxu3 %v729_v11  ;;  %381 = vmatpush.msra.mxu1 %v725_v14 }
  0x17   : > { %747 = vmatpush.msra.mxu2 %v725_v14 }
  0x18   : > { %746 = vmatpush.msrb.mxu3 %v726_v12  ;;  %382 = vmatpush.msra.mxu1 %v722_v15 }
  0x19   : > { %749 = vmatpush.msra.mxu2 %v722_v15 }
  0x1a   : > { %748 = vmatpush.msrb.mxu3 %v725_v14  ;;  %383 = vmatpush.msra.mxu1 %v721_v17 }
  0x1b   : > { %751 = vmatpush.msra.mxu2 %v721_v17 }
  0x1c   : > { %750 = vmatpush.msrb.mxu3 %v722_v15  ;;  %384 = vmatpush.msra.mxu1 %v718_v18 }
  0x1d   : > { %753 = vmatpush.msra.mxu2 %v718_v18 }
  0x1e   : > { %752 = vmatpush.msrb.mxu3 %v721_v17  ;;  %385 = vmatpush.msra.mxu1 %v717_v21 }
  0x1f   : > { %755 = vmatpush.msra.mxu2 %v717_v21 }
  0x20   : > { %754 = vmatpush.msrb.mxu3 %v718_v18  ;;  %386 = vmatpush.msra.mxu1 %v714_v22 }
  0x21   : > { %757 = vmatpush.msra.mxu2 %v714_v22 }
  0x22   : > { %756 = vmatpush.msrb.mxu3 %v717_v21  ;;  %387 = vmatpush.msra.mxu1 %v713_v24 }
  0x23   : > { %680 = vmatmul.msk.bf16.gmra.mxu0 %vm255_vm0, %v692_v4  ;;  %685 = vmatmul.msk.bf16.gmra.mxu3 %vm255_vm0, %v697_v5 }
  0x24   : > { %758 = vmatpush.msrb.mxu3 %v714_v22  ;;  %759 = vmatpush.msra.mxu2 %v713_v24 }
  0x25   : > { %388 = vmatpush.msra.mxu1 %v710_v25 }
  0x26   : > { %760 = vmatpush.msrb.mxu3 %v713_v24  ;;  %761 = vmatpush.msra.mxu2 %v710_v25 }
  0x27   : > { %389 = vmatpush.msra.mxu1 %v709_v27 }
  0x28   : > { %762 = vmatpush.msrb.mxu3 %v710_v25  ;;  %763 = vmatpush.msra.mxu2 %v709_v27 }
  0x29   : > { %390 = vmatpush.msra.mxu1 %v706_v28 }
  0x2a   : > { %764 = vmatpush.msrb.mxu3 %v709_v27  ;;  %765 = vmatpush.msra.mxu2 %v706_v28 }
  0x2b   : > { %391 = vmatpush.msra.mxu1 %v705_v30 }
  0x2c   : > { %766 = vmatpush.msrb.mxu3 %v706_v28  ;;  %767 = vmatpush.msra.mxu2 %v705_v30 }
  0x2d   : > { %392 = vmatpush.msra.mxu1 %v702_v32 }
  0x2e   : > { %768 = vmatpush.msrb.mxu3 %v705_v30  ;;  %769 = vmatpush.msra.mxu2 %v702_v32 }
  0x2f   : > { %393 = vmatpush.msra.mxu1 %v701_v33 }
  0x30   : > { %770 = vmatpush.msrb.mxu3 %v702_v32  ;;  %771 = vmatpush.msra.mxu2 %v701_v33 }
  0x32   : > { %772 = vmatpush.msrb.mxu3 %v701_v33 }
  0x33   : > { %681 = vmatmul.msk.bf16.gmra.mxu0 %vm255_vm0, %v693_v6  ;;  %686 = vmatmul.msk.bf16.gmra.mxu3 %vm255_vm0, %v698_v7 }
  0x43   : > { %682 = vmatmul.msk.bf16.gmra.mxu0 %vm255_vm0, %v694_v19 }
  0x53   : > { %683 = vmatmul.msk.bf16.gmra.mxu0 %vm255_vm0, %v695_v29 }
  0x90   : > { %v289_v37 = vpop.f32.mrf.mxu0 }
  0x91   : > { %v290_v38 = vadd.f32 %v289_v37, %v872_v36 }
  0x93   : > { %vm329_vm1 = vcmp.gt.f32.partialorder %v290_v38, 0.0  ;;  %v345_v39 = vmul.f32 0.01, %v290_v38 }
  0x95   : > { %v361_v40 = vsel %vm329_vm1, %v290_v38, %v345_v39  ;;  %v891_v39 = vperm.slane %v869_v35, 1 }
  0x96   : > { %394 = vmatmul.f32.vlgmr.msra.gmra.mxu1 %v361_v40  ;;  %v314_v47 = vpop.f32.mrf.mxu3 }
  0x97   : > { %v315_v24 = vadd.f32 %v314_v47, %v872_v36 }
  0x98   : > { %v291_v41 = vpop.f32.mrf.mxu0 }
  0x99   : > { %v292_v42 = vadd.f32 %v291_v41, %v872_v36  ;;  %v355_v26 = vmul.f32 0.01, %v315_v24  ;;  %vm339_vm13 = vcmp.gt.f32.partialorder %v315_v24, 0.0 }
  0x9b   : > { %vm330_vm2 = vcmp.gt.f32.partialorder %v292_v42, 0.0  ;;  %v346_v43 = vmul.f32 0.01, %v292_v42  ;;  %v371_v28 = vsel %vm339_vm13, %v315_v24, %v355_v26 }
  0x9d   : > { %v362_v44 = vsel %vm330_vm2, %v292_v42, %v346_v43  ;;  %v895_v42 = vperm.slane %v869_v35, 2 }
  0x9e   : > { %397 = vmatmul.f32.gmra.mxu1 %v362_v44  ;;  %v316_v52 = vpop.f32.mrf.mxu3 }
  0x9f   : > { %v317_v27 = vadd.f32 %v316_v52, %v872_v36 }
  0xa0   : > { %v294_v45 = vpop.f32.mrf.mxu0 }
  0xa1   : > { %v295_v46 = vadd.f32 %v294_v45, %v872_v36  ;;  %v356_v29 = vmul.f32 0.01, %v317_v27  ;;  %vm340_vm14 = vcmp.gt.f32.partialorder %v317_v27, 0.0 }
  0xa3   : > { %vm331_vm3 = vcmp.gt.f32.partialorder %v295_v46, 0.0  ;;  %v347_v48 = vmul.f32 0.01, %v295_v46  ;;  %v372_v31 = vsel %vm340_vm14, %v317_v27, %v356_v29 }
  0xa5   : > { %v363_v49 = vsel %vm331_vm3, %v295_v46, %v347_v48 }
  0xa6   : > { %400 = vmatmul.f32.gmra.mxu1 %v363_v49  ;;  %v319_v57 = vpop.f32.mrf.mxu3 }
  0xa7   : > { %v320_v30 = vadd.f32 %v319_v57, %v872_v36 }
  0xa8   : > { %v296_v50 = vpop.f32.mrf.mxu0 }
  0xa9   : > { %v297_v51 = vadd.f32 %v296_v50, %v872_v36  ;;  %v357_v32 = vmul.f32 0.01, %v320_v30  ;;  %vm341_vm15 = vcmp.gt.f32.partialorder %v320_v30, 0.0 }
  0xab   : > { %vm332_vm4 = vcmp.gt.f32.partialorder %v297_v51, 0.0  ;;  %v348_v53 = vmul.f32 0.01, %v297_v51  ;;  %v373_v34 = vsel %vm341_vm15, %v320_v30, %v357_v32 }
  0xad   : > { %v364_v54 = vsel %vm332_vm4, %v297_v51, %v348_v53 }
  0xae   : > { %403 = vmatmul.f32.gmra.mxu1 %v364_v54  ;;  %v321_v62 = vpop.f32.mrf.mxu3 }
  0xaf   : > { %v322_v33 = vadd.f32 %v321_v62, %v872_v36 }
  0xb0   : > { %v299_v55 = vpop.f32.mrf.mxu0 }
  0xb1   : > { %v300_v56 = vadd.f32 %v299_v55, %v872_v36  ;;  %v358_v37 = vmul.f32 0.01, %v322_v33  ;;  %vm342_vm0 = vcmp.gt.f32.partialorder %v322_v33, 0.0 }
  0xb3   : > { %vm333_vm5 = vcmp.gt.f32.partialorder %v300_v56, 0.0  ;;  %v349_v58 = vmul.f32 0.01, %v300_v56  ;;  %v374_v38 = vsel %vm342_vm0, %v322_v33, %v358_v37 }
  0xb5   : > { %v365_v59 = vsel %vm333_vm5, %v300_v56, %v349_v58 }
  0xb6   : > { %406 = vmatmul.f32.gmra.mxu1 %v365_v59  ;;  %v324_v3 = vpop.f32.mrf.mxu3 }
  0xb7   : > { %v325_v4 = vadd.f32 %v324_v3, %v872_v36 }
  0xb8   : > { %v301_v60 = vpop.f32.mrf.mxu0 }
  0xb9   : > { %v302_v61 = vadd.f32 %v301_v60, %v872_v36  ;;  %v359_v6 = vmul.f32 0.01, %v325_v4  ;;  %vm343_vm8 = vcmp.gt.f32.partialorder %v325_v4, 0.0 }
  0xbb   : > { %vm334_vm6 = vcmp.gt.f32.partialorder %v302_v61, 0.0  ;;  %v350_v63 = vmul.f32 0.01, %v302_v61  ;;  %v375_v8 = vsel %vm343_vm8, %v325_v4, %v359_v6 }
  0xbc   : > { %436 = vmatmul.f32.vlgmr.msrb.gmra.mxu3 %v375_v8 }
  0xbd   : > { %v366_v0 = vsel %vm334_vm6, %v302_v61, %v350_v63 }
  0xbe   : > { %409 = vmatmul.f32.gmra.mxu1 %v366_v0  ;;  %v326_v11 = vpop.f32.mrf.mxu3 }
  0xbf   : > { %v327_v12 = vadd.f32 %v326_v11, %v872_v36 }
  0xc0   : > { %v304_v1 = vpop.f32.mrf.mxu0 }
  0xc1   : > { %v305_v2 = vadd.f32 %v304_v1, %v872_v36  ;;  %vm344_vm10 = vcmp.gt.f32.partialorder %v327_v12, 0.0  ;;  %v360_v15 = vmul.f32 0.01, %v327_v12 }
  0xc3   : > { %vm335_vm7 = vcmp.gt.f32.partialorder %v305_v2, 0.0  ;;  %v351_v5 = vmul.f32 0.01, %v305_v2  ;;  %v376_v17 = vsel %vm344_vm10, %v327_v12, %v360_v15 }
  0xc4   : > { %439 = vmatmul.f32.gmra.mxu3 %v376_v17 }
  0xc5   : > { %v367_v7 = vsel %vm335_vm7, %v305_v2, %v351_v5 }
  0xc6   : > { %412 = vmatmul.f32.gmra.mxu1 %v367_v7 }
  0xc8   : > { %v306_v9 = vpop.f32.mrf.mxu0 }
  0xc9   : > { %v307_v10 = vadd.f32 %v306_v9, %v872_v36 }
  0xcb   : > { %vm336_vm9 = vcmp.gt.f32.partialorder %v307_v10, 0.0  ;;  %v352_v13 = vmul.f32 0.01, %v307_v10 }
  0xcd   : > { %v368_v14 = vsel %vm336_vm9, %v307_v10, %v352_v13 }
  0xce   : > { %415 = vmatmul.f32.vlgmr.msra.gmra.mxu2 %v368_v14 }
  0xd0   : > { %v309_v16 = vpop.f32.mrf.mxu0 }
  0xd1   : > { %v310_v18 = vadd.f32 %v309_v16, %v872_v36 }
  0xd3   : > { %vm337_vm11 = vcmp.gt.f32.partialorder %v310_v18, 0.0  ;;  %v353_v19 = vmul.f32 0.01, %v310_v18 }
  0xd5   : > { %v369_v20 = vsel %vm337_vm11, %v310_v18, %v353_v19 }
  0xd6   : > { %418 = vmatmul.f32.gmra.mxu2 %v369_v20 }
  0xd8   : > { %v311_v21 = vpop.f32.mrf.mxu0 }
  0xd9   : > { %v312_v22 = vadd.f32 %v311_v21, %v872_v36 }
  0xdb   : > { %vm338_vm12 = vcmp.gt.f32.partialorder %v312_v22, 0.0  ;;  %v354_v23 = vmul.f32 0.01, %v312_v22 }
  0xdd   : > { %v370_v25 = vsel %vm338_vm12, %v312_v22, %v354_v23 }
  0xde   : > { %421 = vmatmul.f32.gmra.mxu2 %v370_v25 }
  0xe6   : > { %424 = vmatmul.f32.gmra.mxu2 %v371_v28 }
  0xee   : > { %427 = vmatmul.f32.gmra.mxu2 %v372_v31 }
  0xf6   : > { %430 = vmatmul.f32.gmra.mxu2 %v373_v34 }
  0xfe   : > { %433 = vmatmul.f32.gmra.mxu2 %v374_v38 }
 0x113   : > { %v395_v40 = vpop.f32.mrf.mxu1 }
 0x114   : > { %v396_v41 = vadd.f32 %v395_v40, %v891_v39 }
 0x116   : > { %v459_v43 = vmul.f32 0.01, %v396_v41  ;;  %vm443_vm1 = vcmp.gt.f32.partialorder %v396_v41, 0.0 }
 0x118   : > { %v475_v44 = vsel %vm443_vm1, %v396_v41, %v459_v43  ;;  %vm557_vm1 = vcmask 7168  }
 0x119   : > { %v492_v36 = vmul.f32 %v895_v42, %v475_v44 }
 0x11b   : > { %v398_v45 = vpop.f32.mrf.mxu1  ;;  %508 = vadd.xlane.f32.xlu0 %v492_v36 }
 0x11c   : > { %v399_v46 = vadd.f32 %v398_v45, %v891_v39 }
 0x11e   : > { %v460_v47 = vmul.f32 0.01, %v399_v46  ;;  %vm444_vm2 = vcmp.gt.f32.partialorder %v399_v46, 0.0 }
 0x120   : > { %v476_v48 = vsel %vm444_vm2, %v399_v46, %v460_v47 }
 0x121   : > { %v493_v49 = vmul.f32 %v895_v42, %v476_v48 }
 0x123   : > { %v401_v50 = vpop.f32.mrf.mxu1  ;;  %510 = vadd.xlane.f32.xlu0 %v493_v49 }
 0x124   : > { %v402_v51 = vadd.f32 %v401_v50, %v891_v39 }
 0x126   : > { %v461_v52 = vmul.f32 0.01, %v402_v51  ;;  %vm445_vm3 = vcmp.gt.f32.partialorder %v402_v51, 0.0 }
 0x128   : > { %v477_v53 = vsel %vm445_vm3, %v402_v51, %v461_v52 }
 0x129   : > { %v494_v54 = vmul.f32 %v895_v42, %v477_v53 }
 0x12b   : > { %v404_v55 = vpop.f32.mrf.mxu1  ;;  %512 = vadd.xlane.f32.xlu1 %v494_v54 }
 0x12c   : > { %v405_v56 = vadd.f32 %v404_v55, %v891_v39 }
 0x12e   : > { %v462_v57 = vmul.f32 0.01, %v405_v56  ;;  %vm446_vm4 = vcmp.gt.f32.partialorder %v405_v56, 0.0 }
 0x130   : > { %v478_v58 = vsel %vm446_vm4, %v405_v56, %v462_v57 }
 0x131   : > { %v495_v59 = vmul.f32 %v895_v42, %v478_v58 }
 0x133   : > { %v407_v60 = vpop.f32.mrf.mxu1  ;;  %514 = vadd.xlane.f32.xlu1 %v495_v59  ;;  %v540_v59 = vperm.slane %v869_v35, 3 }
 0x134   : > { %v408_v61 = vadd.f32 %v407_v60, %v891_v39 }
 0x136   : > { %v463_v62 = vmul.f32 0.01, %v408_v61  ;;  %vm447_vm5 = vcmp.gt.f32.partialorder %v408_v61, 0.0 }
 0x138   : > { %v479_v63 = vsel %vm447_vm5, %v408_v61, %v463_v62 }
 0x139   : > { %v496_v0 = vmul.f32 %v895_v42, %v479_v63 }
 0x13b   : > { %v410_v1 = vpop.f32.mrf.mxu1  ;;  %516 = vadd.xlane.f32.xlu2 %v496_v0 }
 0x13c   : > { %v411_v2 = vadd.f32 %v410_v1, %v891_v39 }
 0x13e   : > { %v464_v3 = vmul.f32 0.01, %v411_v2  ;;  %vm448_vm6 = vcmp.gt.f32.partialorder %v411_v2, 0.0 }
 0x13f   : > { %v437_v30 = vpop.f32.mrf.mxu3 }
 0x140   : > { %v480_v4 = vsel %vm448_vm6, %v411_v2, %v464_v3  ;;  %v438_v34 = vadd.f32 %v437_v30, %v891_v39 }
 0x141   : > { %v497_v5 = vmul.f32 %v895_v42, %v480_v4 }
 0x142   : > { %v473_v41 = vmul.f32 0.01, %v438_v34  ;;  %vm457_vm13 = vcmp.gt.f32.partialorder %v438_v34, 0.0 }
 0x143   : > { %v413_v6 = vpop.f32.mrf.mxu1  ;;  %518 = vadd.xlane.f32.xlu2 %v497_v5 }
 0x144   : > { %v414_v7 = vadd.f32 %v413_v6, %v891_v39  ;;  %v489_v47 = vsel %vm457_vm13, %v438_v34, %v473_v41 }
 0x145   : > { %v506_v49 = vmul.f32 %v895_v42, %v489_v47 }
 0x146   : > { %v465_v8 = vmul.f32 0.01, %v414_v7  ;;  %vm449_vm7 = vcmp.gt.f32.partialorder %v414_v7, 0.0 }
 0x147   : > { %v440_v43 = vpop.f32.mrf.mxu3 }
 0x148   : > { %v481_v9 = vsel %vm449_vm7, %v414_v7, %v465_v8  ;;  %v441_v45 = vadd.f32 %v440_v43, %v891_v39 }
 0x149   : > { %v498_v10 = vmul.f32 %v895_v42, %v481_v9 }
 0x14a   : > { %v474_v51 = vmul.f32 0.01, %v441_v45  ;;  %vm458_vm15 = vcmp.gt.f32.partialorder %v441_v45, 0.0 }
 0x14b   : > { %520 = vadd.xlane.f32.xlu0 %v498_v10 }
 0x14c   : > { %v490_v55 = vsel %vm458_vm15, %v441_v45, %v474_v51 }
 0x14d   : > { %v507_v58 = vmul.f32 %v895_v42, %v490_v55 }
 0x151   : > { %v416_v11 = vpop.f32.mrf.mxu2 }
 0x152   : > { %v417_v12 = vadd.f32 %v416_v11, %v891_v39 }
 0x154   : > { %v466_v13 = vmul.f32 0.01, %v417_v12  ;;  %vm450_vm8 = vcmp.gt.f32.partialorder %v417_v12, 0.0 }
 0x156   : > { %v482_v14 = vsel %vm450_vm8, %v417_v12, %v466_v13 }
 0x157   : > { %v499_v15 = vmul.f32 %v895_v42, %v482_v14 }
 0x159   : > { %v419_v16 = vpop.f32.mrf.mxu2  ;;  %522 = vadd.xlane.f32.xlu1 %v499_v15 }
 0x15a   : > { %v420_v17 = vadd.f32 %v419_v16, %v891_v39 }
 0x15c   : > { %v467_v18 = vmul.f32 0.01, %v420_v17  ;;  %vm451_vm9 = vcmp.gt.f32.partialorder %v420_v17, 0.0 }
 0x15e   : > { %v483_v19 = vsel %vm451_vm9, %v420_v17, %v467_v18 }
 0x15f   : > { %v500_v20 = vmul.f32 %v895_v42, %v483_v19 }
 0x161   : > { %v422_v21 = vpop.f32.mrf.mxu2  ;;  %524 = vadd.xlane.f32.xlu2 %v500_v20 }
 0x162   : > { %v423_v22 = vadd.f32 %v422_v21, %v891_v39 }
 0x164   : > { %v468_v23 = vmul.f32 0.01, %v423_v22  ;;  %vm452_vm10 = vcmp.gt.f32.partialorder %v423_v22, 0.0 }
 0x166   : > { %v484_v24 = vsel %vm452_vm10, %v423_v22, %v468_v23 }
 0x167   : > { %v501_v25 = vmul.f32 %v895_v42, %v484_v24 }
 0x169   : > { %v425_v26 = vpop.f32.mrf.mxu2  ;;  %526 = vadd.xlane.f32.xlu0 %v501_v25 }
 0x16a   : > { %v426_v27 = vadd.f32 %v425_v26, %v891_v39 }
 0x16c   : > { %v469_v28 = vmul.f32 0.01, %v426_v27  ;;  %vm453_vm11 = vcmp.gt.f32.partialorder %v426_v27, 0.0 }
 0x16e   : > { %v485_v29 = vsel %vm453_vm11, %v426_v27, %v469_v28 }
 0x16f   : > { %v502_v31 = vmul.f32 %v895_v42, %v485_v29 }
 0x171   : > { %v428_v32 = vpop.f32.mrf.mxu2  ;;  %528 = vadd.xlane.f32.xlu1 %v502_v31 }
 0x172   : > { %v429_v33 = vadd.f32 %v428_v32, %v891_v39 }
 0x174   : > { %v470_v37 = vmul.f32 0.01, %v429_v33  ;;  %vm454_vm12 = vcmp.gt.f32.partialorder %v429_v33, 0.0 }
 0x176   : > { %v486_v38 = vsel %vm454_vm12, %v429_v33, %v470_v37 }
 0x177   : > { %v503_v40 = vmul.f32 %v895_v42, %v486_v38 }
 0x179   : > { %v431_v44 = vpop.f32.mrf.mxu2  ;;  %530 = vadd.xlane.f32.xlu2 %v503_v40 }
 0x17a   : > { %v432_v36 = vadd.f32 %v431_v44, %v891_v39 }
 0x17c   : > { %v471_v46 = vmul.f32 0.01, %v432_v36  ;;  %vm455_vm14 = vcmp.gt.f32.partialorder %v432_v36, 0.0 }
 0x17e   : > { %v487_v48 = vsel %vm455_vm14, %v432_v36, %v471_v46 }
 0x17f   : > { %v504_v50 = vmul.f32 %v895_v42, %v487_v48 }
 0x181   : > { %v434_v52 = vpop.f32.mrf.mxu2  ;;  %536 = vadd.xlane.f32.xlu2 %v506_v49  ;;  %532 = vadd.xlane.f32.xlu0 %v504_v50 }
 0x182   : > { %v435_v53 = vadd.f32 %v434_v52, %v891_v39 }
 0x184   : > { %v472_v54 = vmul.f32 0.01, %v435_v53  ;;  %vm456_vm0 = vcmp.gt.f32.partialorder %v435_v53, 0.0 }
 0x186   : > { %v488_v56 = vsel %vm456_vm0, %v435_v53, %v472_v54 }
 0x187   : > { %v505_v57 = vmul.f32 %v895_v42, %v488_v56 }
 0x189   : > { %534 = vadd.xlane.f32.xlu1 %v505_v57  ;;  %538 = vadd.xlane.f32.xlu0 %v507_v58 }
 0x18e   : > { %v509_v39 = vpop.xlane.xlu0 %508 }
 0x18f   : > { %v541_v60 = vadd.f32 %v540_v59, %v509_v39 }
 0x191   : > { %558 = vst.msk [vmem:[%s933_s15] sm:$0xff] %vm557_vm1, %v541_v60 }
 0x196   : > { %v511_v42 = vpop.xlane.xlu0 %510 }
 0x197   : > { %v542_v61 = vadd.f32 %v540_v59, %v511_v42 }
 0x199   : > { %559 = vst.msk [vmem:[%s933_s15 + $0x8] sm:$0xff] %vm557_vm1, %v542_v61 }
 0x19e   : > { %v513_v35 = vpop.xlane.xlu1 %512 }
 0x19f   : > { %v543_v62 = vadd.f32 %v540_v59, %v513_v35 }
 0x1a1   : > { %560 = vst.msk [vmem:[%s933_s15 + $0x10] sm:$0xff] %vm557_vm1, %v543_v62 }
 0x1a6   : > { %v515_v63 = vpop.xlane.xlu1 %514 }
 0x1a7   : > { %v544_v0 = vadd.f32 %v540_v59, %v515_v63 }
 0x1a9   : > { %561 = vst.msk [vmem:[%s933_s15 + $0x18] sm:$0xff] %vm557_vm1, %v544_v0 }
 0x1ae   : > { %v517_v1 = vpop.xlane.xlu2 %516 }
 0x1af   : > { %v545_v2 = vadd.f32 %v540_v59, %v517_v1 }
 0x1b1   : > { %562 = vst.msk [vmem:[%s933_s15 + $0x20] sm:$0xff] %vm557_vm1, %v545_v2 }
 0x1b6   : > { %v519_v3 = vpop.xlane.xlu2 %518 }
 0x1b7   : > { %v546_v4 = vadd.f32 %v540_v59, %v519_v3 }
 0x1b9   : > { %563 = vst.msk [vmem:[%s933_s15 + $0x28] sm:$0xff] %vm557_vm1, %v546_v4 }
 0x1be   : > { %v521_v5 = vpop.xlane.xlu0 %520 }
 0x1bf   : > { %v547_v6 = vadd.f32 %v540_v59, %v521_v5 }
 0x1c1   : > { %564 = vst.msk [vmem:[%s933_s15 + $0x30] sm:$0xff] %vm557_vm1, %v547_v6 }
 0x1cc   : > { %v523_v7 = vpop.xlane.xlu1 %522 }
 0x1cd   : > { %v548_v8 = vadd.f32 %v540_v59, %v523_v7 }
 0x1cf   : > { %565 = vst.msk [vmem:[%s933_s15 + $0x38] sm:$0xff] %vm557_vm1, %v548_v8 }
 0x1d4   : > { %v525_v9 = vpop.xlane.xlu2 %524 }
 0x1d5   : > { %v549_v10 = vadd.f32 %v540_v59, %v525_v9 }
 0x1d7   : > { %566 = vst.msk [vmem:[%s933_s15 + $0x40] sm:$0xff] %vm557_vm1, %v549_v10 }
 0x1dc   : > { %v527_v11 = vpop.xlane.xlu0 %526 }
 0x1dd   : > { %v550_v12 = vadd.f32 %v540_v59, %v527_v11 }
 0x1df   : > { %567 = vst.msk [vmem:[%s933_s15 + $0x48] sm:$0xff] %vm557_vm1, %v550_v12 }
 0x1e4   : > { %v529_v13 = vpop.xlane.xlu1 %528 }
 0x1e5   : > { %v551_v14 = vadd.f32 %v540_v59, %v529_v13 }
 0x1e7   : > { %568 = vst.msk [vmem:[%s933_s15 + $0x50] sm:$0xff] %vm557_vm1, %v551_v14 }
 0x1ec   : > { %v531_v15 = vpop.xlane.xlu2 %530 }
 0x1ed   : > { %v552_v16 = vadd.f32 %v540_v59, %v531_v15 }
 0x1ef   : > { %569 = vst.msk [vmem:[%s933_s15 + $0x58] sm:$0xff] %vm557_vm1, %v552_v16 }
 0x1f4   : > { %v537_v17 = vpop.xlane.xlu2 %536  ;;  %v533_v18 = vpop.xlane.xlu0 %532 }
 0x1f5   : > { %v555_v19 = vadd.f32 %v540_v59, %v537_v17  ;;  %v553_v20 = vadd.f32 %v540_v59, %v533_v18 }
 0x1f7   : > { %572 = vst.msk [vmem:[%s933_s15 + $0x70] sm:$0xff] %vm557_vm1, %v555_v19 }
 0x1f8   : > { %570 = vst.msk [vmem:[%s933_s15 + $0x60] sm:$0xff] %vm557_vm1, %v553_v20 }
 0x1fc   : > { %v535_v21 = vpop.xlane.xlu1 %534  ;;  %v539_v22 = vpop.xlane.xlu0 %538 }
 0x1fd   : > { %v554_v23 = vadd.f32 %v540_v59, %v535_v21  ;;  %v556_v24 = vadd.f32 %v540_v59, %v539_v22 }
 0x1ff   : > { %571 = vst.msk [vmem:[%s933_s15 + $0x68] sm:$0xff] %vm557_vm1, %v554_v23 }
 0x200   : > { %573 = vst.msk [vmem:[%s933_s15 + $0x78] sm:$0xff] %vm557_vm1, %v556_v24 }
 0x201 PF: > { %s12_s9 = sadd.s32 1, %s787_s9  }
 0x202   : > { %p9_p4 = scmp.ge.s32.totalorder %s12_s9, 4  }
 0x204   :  { %11 = sbr.rel (!%p9_p4) target bundleno = 1 (0x1), region = 58 }

</bundles_post_ra>
